<compile_context>
chip_gen: v7x
topology: tpu7x:2x2x1
jax: 0.10.0
libtpu: 0.0.40
codegen_flags: <defaults>
</compile_context>

<pallas_src>
import functools
import math

import jax
import jax.numpy as jnp
from jax.experimental import pallas as pl
from jax.experimental.pallas import tpu as pltpu


# ----------------------------------------------------------------------------
# Tiling helper
# ----------------------------------------------------------------------------
def _pick_tile(dim, desired, quantum):
    """Largest tile <= desired that divides `dim` and is a multiple of `quantum`.

    Falls back to the full dim (always a legal TPU block shape)."""
    if dim <= desired:
        return dim
    t = (desired // quantum) * quantum
    while t >= quantum:
        if dim % t == 0:
            return t
        t -= quantum
    return dim


# ----------------------------------------------------------------------------
# Tiled linear (bias / GELU / residual fused into the epilogue)
# ----------------------------------------------------------------------------
def _linear_kernel(*refs, activation, has_residual):
    if has_residual:
        x_ref, w_ref, b_ref, r_ref, o_ref, acc_ref = refs
    else:
        x_ref, w_ref, b_ref, o_ref, acc_ref = refs
        r_ref = None
    k = pl.program_id(2)

    @pl.when(k == 0)
    def _():
        acc_ref[...] = jnp.zeros_like(acc_ref)

    acc_ref[...] += jnp.dot(x_ref[...], w_ref[...],
                            preferred_element_type=jnp.float32)

    @pl.when(k == pl.num_programs(2) - 1)
    def _():
        y = acc_ref[...] + b_ref[...]
        if activation == "gelu":
            # GPT-2 uses the tanh-approximate GELU ("gelu_new"); keep it in f32.
            y = jax.nn.gelu(y, approximate=True)
        if has_residual:
            y = y + r_ref[...]
        o_ref[...] = y.astype(o_ref.dtype)


def linear(x2d, w, b, *, activation=None, residual=None,
           out_dtype=jnp.float32, tm=256, tn=512, tk=512):
    """y = act(x @ w + b) [+ residual].  x2d: [M, K], w: [K, N], b: [N].

    MXU inputs in bf16, f32 accumulation, tiled 3-D grid with K last."""
    M, K = x2d.shape
    K2, N = w.shape
    assert K == K2

    x_bf = x2d.astype(jnp.bfloat16)
    w_bf = w.astype(jnp.bfloat16)
    b2 = b.reshape(1, N).astype(jnp.float32)

    tm = _pick_tile(M, tm, 16)     # 16 covers f32(8) and bf16(16) sublane quanta
    tn = _pick_tile(N, tn, 128)
    tk = _pick_tile(K, tk, 128)
    grid = (M // tm, N // tn, K // tk)

    in_specs = [
        pl.BlockSpec((tm, tk), lambda i, j, k: (i, k)),
        pl.BlockSpec((tk, tn), lambda i, j, k: (k, j)),
        pl.BlockSpec((1, tn), lambda i, j, k: (0, j)),
    ]
    args = [x_bf, w_bf, b2]
    if residual is not None:
        in_specs.append(pl.BlockSpec((tm, tn), lambda i, j, k: (i, j)))
        args.append(residual.astype(jnp.float32))

    kern = functools.partial(_linear_kernel, activation=activation,
                             has_residual=residual is not None)
    return pl.pallas_call(
        kern,
        out_shape=jax.ShapeDtypeStruct((M, N), out_dtype),
        grid=grid,
        in_specs=in_specs,
        out_specs=pl.BlockSpec((tm, tn), lambda i, j, k: (i, j)),
        scratch_shapes=[pltpu.VMEM((tm, tn), jnp.float32)],
        compiler_params=pltpu.CompilerParams(
            dimension_semantics=("parallel", "parallel", "arbitrary")),
    )(*args)


# ----------------------------------------------------------------------------
# Row-tiled LayerNorm
# ----------------------------------------------------------------------------
def _layernorm_kernel(x_ref, g_ref, b_ref, o_ref, *, eps):
    x = x_ref[...].astype(jnp.float32)
    mu = jnp.mean(x, axis=-1, keepdims=True)
    var = jnp.mean(jnp.square(x - mu), axis=-1, keepdims=True)
    y = (x - mu) * jax.lax.rsqrt(var + eps) * g_ref[...] + b_ref[...]
    o_ref[...] = y.astype(o_ref.dtype)


def layer_norm(x2d, gamma, beta, *, eps=1e-5, out_dtype=jnp.float32, tm=512):
    M, D = x2d.shape
    tm = _pick_tile(M, tm, 8)
    kern = functools.partial(_layernorm_kernel, eps=eps)
    return pl.pallas_call(
        kern,
        out_shape=jax.ShapeDtypeStruct((M, D), out_dtype),
        grid=(M // tm,),
        in_specs=[
            pl.BlockSpec((tm, D), lambda i: (i, 0)),
            pl.BlockSpec((1, D), lambda i: (0, 0)),
            pl.BlockSpec((1, D), lambda i: (0, 0)),
        ],
        out_specs=pl.BlockSpec((tm, D), lambda i: (i, 0)),
        compiler_params=pltpu.CompilerParams(
            dimension_semantics=("parallel",)),
    )(x2d, gamma.reshape(1, D).astype(jnp.float32),
      beta.reshape(1, D).astype(jnp.float32))


# ----------------------------------------------------------------------------
# Attention: per-batch block over the fused [B, T, 3d] QKV slab.
# Causal mask built on-chip from iota; padding arrives as a [B, 1, T] additive.
# ----------------------------------------------------------------------------
def _attention_kernel(qkv_ref, pad_ref, o_ref, *, num_heads, scale):
    T = qkv_ref.shape[1]
    d3 = qkv_ref.shape[2]
    d = d3 // 3
    dh = d // num_heads

    qkv = qkv_ref[0]                     # [T, 3d] bf16
    pad_add = pad_ref[0]                 # [1, T] f32 additive (-10000 on pads)

    rows = jax.lax.broadcasted_iota(jnp.int32, (T, T), 0)
    cols = jax.lax.broadcasted_iota(jnp.int32, (T, T), 1)
    mask_add = jnp.where(cols <= rows, 0.0, -1e9).astype(jnp.float32) + pad_add

    outs = []
    for h in range(num_heads):           # unrolled; H is small and static
        q = qkv[:, h * dh:(h + 1) * dh]
        k = qkv[:, d + h * dh: d + (h + 1) * dh]
        v = qkv[:, 2 * d + h * dh: 2 * d + (h + 1) * dh]
        # fold 1/sqrt(dh) into q ([T, dh]) instead of scaling scores ([T, T])
        q = (q.astype(jnp.float32) * scale).astype(jnp.bfloat16)
        s = jax.lax.dot_general(q, k, (((1,), (1,)), ((), ())),
                                preferred_element_type=jnp.float32)   # [T, T]
        s = s + mask_add
        s = s - jnp.max(s, axis=-1, keepdims=True)
        p = jnp.exp(s)
        p = p * pl.reciprocal(jnp.sum(p, axis=-1, keepdims=True), approx=True)
        outs.append(jnp.dot(p.astype(jnp.bfloat16), v,
                            preferred_element_type=jnp.float32))      # [T, dh]
    # write one lane-dense [T, d] slab per batch
    o_ref[0] = jnp.concatenate(outs, axis=-1).astype(o_ref.dtype)
    # TODO(synk): for long sequences switch to a KV-tiled online-softmax (flash)
    # form so the [T, T] score tile never materializes (v7x VMEM budget).


def attention(qkv, pad_add, *, num_heads):
    """qkv: [B, T, 3d] bf16 fused projections; pad_add: [B, 1, T] f32 additive."""
    B, T, d3 = qkv.shape
    d = d3 // 3
    dh = d // num_heads
    kern = functools.partial(_attention_kernel, num_heads=num_heads,
                             scale=1.0 / math.sqrt(dh))
    return pl.pallas_call(
        kern,
        out_shape=jax.ShapeDtypeStruct((B, T, d), jnp.bfloat16),
        grid=(B,),
        in_specs=[
            pl.BlockSpec((1, T, d3), lambda b: (b, 0, 0)),
            pl.BlockSpec((1, 1, T), lambda b: (b, 0, 0)),
        ],
        out_specs=pl.BlockSpec((1, T, d), lambda b: (b, 0, 0)),
        compiler_params=pltpu.CompilerParams(
            dimension_semantics=("parallel",)),
    )(qkv.astype(jnp.bfloat16), pad_add.astype(jnp.float32))


# ----------------------------------------------------------------------------
# GPT-2 model (SonnetGPT.forward)
# ----------------------------------------------------------------------------
def init_params(key, *, vocab, max_pos, d, num_layers, num_heads):
    def nrm(k, shape, scale=0.02):
        return (scale * jax.random.normal(k, shape)).astype(jnp.float32)

    keys = jax.random.split(key, 2 + num_layers)
    wte = nrm(keys[0], (vocab, d))
    params = {
        "wte": wte,                                           # f32, embedding gather
        "lm_head_w": wte.T.astype(jnp.bfloat16),              # tied head, pre-transposed once
        "lm_head_b": jnp.zeros((vocab,), jnp.float32),
        "wpe": nrm(keys[1], (max_pos, d)),
        "ln_f_g": jnp.ones((d,), jnp.float32),
        "ln_f_b": jnp.zeros((d,), jnp.float32),
        "layers": [],
        "num_heads": num_heads,
    }
    for li in range(num_layers):
        lk = jax.random.split(keys[2 + li], 6)
        wq, wk, wv = nrm(lk[0], (d, d)), nrm(lk[1], (d, d)), nrm(lk[2], (d, d))
        params["layers"].append({
            "ln1_g": jnp.ones((d,), jnp.float32),
            "ln1_b": jnp.zeros((d,), jnp.float32),
            # fused QKV projection weight [d, 3d] (bf16 for the MXU)
            "wqkv": jnp.concatenate([wq, wk, wv], axis=1).astype(jnp.bfloat16),
            "bqkv": jnp.zeros((3 * d,), jnp.float32),
            "wo": nrm(lk[3], (d, d)).astype(jnp.bfloat16),
            "bo": jnp.zeros((d,), jnp.float32),
            "ln2_g": jnp.ones((d,), jnp.float32),
            "ln2_b": jnp.zeros((d,), jnp.float32),
            "w1": nrm(lk[4], (d, 4 * d)).astype(jnp.bfloat16),
            "b1": jnp.zeros((4 * d,), jnp.float32),
            "w2": nrm(lk[5], (4 * d, d)).astype(jnp.bfloat16),
            "b2": jnp.zeros((d,), jnp.float32),
        })
    return params


def sonnet_gpt_forward(params, input_ids, attention_mask,
                       output_hidden_states=False):
    """Mirrors SonnetGPT.forward: per-token logits over the vocab."""
    B, T = input_ids.shape
    d = params["wte"].shape[1]
    H = params["num_heads"]

    # Embeddings (glue: gather outside the kernels).  Residual stream in f32.
    x = params["wte"][input_ids] + params["wpe"][:T][None, :, :]      # [B, T, d]
    h = x.astype(jnp.float32).reshape(B * T, d)

    # Tiny additive padding mask [B, 1, T] (GPT-2 style -10000 on pads).
    # The causal part is generated on-chip inside the attention kernel.
    pad_add = ((1.0 - attention_mask.astype(jnp.float32)) * -10000.0
               ).reshape(B, 1, T)

    for lp in params["layers"]:
        # --- self attention block (pre-LN) ---
        a_in = layer_norm(h, lp["ln1_g"], lp["ln1_b"], out_dtype=jnp.bfloat16)
        qkv = linear(a_in, lp["wqkv"], lp["bqkv"], out_dtype=jnp.bfloat16)
        ctx = attention(qkv.reshape(B, T, 3 * d), pad_add, num_heads=H)
        h = linear(ctx.reshape(B * T, d), lp["wo"], lp["bo"], residual=h)
        # --- MLP block (pre-LN) ---
        m_in = layer_norm(h, lp["ln2_g"], lp["ln2_b"], out_dtype=jnp.bfloat16)
        hid = linear(m_in, lp["w1"], lp["b1"], activation="gelu",
                     out_dtype=jnp.bfloat16)
        h = linear(hid, lp["w2"], lp["b2"], residual=h)

    # Final layer norm -> last_hidden_state.
    h = layer_norm(h, params["ln_f_g"], params["ln_f_b"])
    hidden_states = h.reshape(B, T, d)

    # hidden_state_to_token: weight-tied projection, vocab axis tiled.
    vocab = params["lm_head_w"].shape[1]
    logits = linear(h, params["lm_head_w"], params["lm_head_b"], tn=512)
    logits = logits.reshape(B, T, vocab)

    if output_hidden_states:
        return logits, hidden_states
    return logits


# ----------------------------------------------------------------------------
# TODO(synk): generate_contrastive_search is autoregressive host-side decoding
# (top-k, n-gram bans, cosine-sim repulsion, tokenizer decode) — data-dependent
# Python control flow, not a kernel; only the forward pass is implemented.
# ----------------------------------------------------------------------------


if __name__ == "__main__":
    # Small GPT-2-like config implied by the module's forward.
    B, T = 2, 8
    VOCAB, MAX_POS, D, LAYERS, HEADS = 64, 16, 32, 2, 2

    key = jax.random.PRNGKey(0)
    k_params, k_ids = jax.random.split(key)
    params = init_params(k_params, vocab=VOCAB, max_pos=MAX_POS, d=D,
                         num_layers=LAYERS, num_heads=HEADS)

    input_ids = jax.random.randint(k_ids, (B, T), 0, VOCAB, dtype=jnp.int32)
    attention_mask = jnp.array(
        [[1, 1, 1, 1, 1, 1, 1, 1],
         [1, 1, 1, 1, 1, 1, 0, 0]], dtype=jnp.int32)

    logits, hidden = sonnet_gpt_forward(params, input_ids, attention_mask,
                                        output_hidden_states=True)
    jax.block_until_ready((logits, hidden))
    assert logits.shape == (B, T, VOCAB)
    assert hidden.shape == (B, T, D)
    assert bool(jnp.all(jnp.isfinite(logits)))
    print("KERNEL_OK")
</pallas_src>

<mosaic_0001>
module attributes {stable_mosaic.version = 11 : i64} {
  func.func @_layernorm_kernel(%arg0: i32, %arg1: memref<16x32xf32, #tpu.memory_space<vmem>>, %arg2: memref<1x32xf32, #tpu.memory_space<vmem>>, %arg3: memref<1x32xf32, #tpu.memory_space<vmem>>, %arg4: memref<16x32xbf16, #tpu.memory_space<vmem>>) attributes {dimension_semantics = [#tpu.dimension_semantics<parallel>], iteration_bounds = array<i64: 1>, scalar_prefetch = 0 : i64, scratch_operands = 0 : i64, tpu.core_type = #tpu.core_type<tc>, window_params = [{transform_indices = @transform_0, window_bounds = array<i64: 16, 32>}, {pipeline_mode = #tpu.pipeline_mode<synchronous>, transform_indices = @transform_1, window_bounds = array<i64: 1, 32>}, {pipeline_mode = #tpu.pipeline_mode<synchronous>, transform_indices = @transform_2, window_bounds = array<i64: 1, 32>}, {transform_indices = @transform_3, window_bounds = array<i64: 16, 32>}]} {
    %c0 = arith.constant 0 : index
    %c0_0 = arith.constant 0 : index
    %0 = vector.load %arg1[%c0, %c0_0] : memref<16x32xf32, #tpu.memory_space<vmem>>, vector<16x32xf32>
    %cst = arith.constant dense<0.000000e+00> : vector<16xf32>
    %1 = vector.multi_reduction <add>, %0, %cst [1] : vector<16x32xf32> to vector<16xf32>
    %2 = vector.shape_cast %1 : vector<16xf32> to vector<16x1xf32>
    %cst_1 = arith.constant 3.200000e+01 : f32
    %3 = vector.broadcast %cst_1 : f32 to vector<16x1xf32>
    %4 = arith.divf %2, %3 : vector<16x1xf32>
    %5 = vector.broadcast %4 : vector<16x1xf32> to vector<16x32xf32>
    %6 = arith.subf %0, %5 : vector<16x32xf32>
    %7 = arith.mulf %6, %6 : vector<16x32xf32>
    %cst_2 = arith.constant dense<0.000000e+00> : vector<16xf32>
    %8 = vector.multi_reduction <add>, %7, %cst_2 [1] : vector<16x32xf32> to vector<16xf32>
    %9 = vector.shape_cast %8 : vector<16xf32> to vector<16x1xf32>
    %cst_3 = arith.constant 3.200000e+01 : f32
    %10 = vector.broadcast %cst_3 : f32 to vector<16x1xf32>
    %11 = arith.divf %9, %10 : vector<16x1xf32>
    %12 = vector.broadcast %4 : vector<16x1xf32> to vector<16x32xf32>
    %13 = arith.subf %0, %12 : vector<16x32xf32>
    %cst_4 = arith.constant 9.99999974E-6 : f32
    %14 = vector.broadcast %cst_4 : f32 to vector<16x1xf32>
    %15 = arith.addf %11, %14 : vector<16x1xf32>
    %16 = math.rsqrt %15 : vector<16x1xf32>
    %17 = vector.broadcast %16 : vector<16x1xf32> to vector<16x32xf32>
    %18 = arith.mulf %13, %17 : vector<16x32xf32>
    %c0_5 = arith.constant 0 : index
    %c0_6 = arith.constant 0 : index
    %19 = vector.load %arg2[%c0_5, %c0_6] : memref<1x32xf32, #tpu.memory_space<vmem>>, vector<1x32xf32>
    %20 = vector.broadcast %19 : vector<1x32xf32> to vector<16x32xf32>
    %21 = arith.mulf %18, %20 : vector<16x32xf32>
    %c0_7 = arith.constant 0 : index
    %c0_8 = arith.constant 0 : index
    %22 = vector.load %arg3[%c0_7, %c0_8] : memref<1x32xf32, #tpu.memory_space<vmem>>, vector<1x32xf32>
    %23 = vector.broadcast %22 : vector<1x32xf32> to vector<16x32xf32>
    %24 = arith.addf %21, %23 : vector<16x32xf32>
    %25 = arith.truncf %24 : vector<16x32xf32> to vector<16x32xbf16>
    %c0_9 = arith.constant 0 : index
    %c0_10 = arith.constant 0 : index
    %26 = vector.load %arg4[%c0_9, %c0_10] : memref<16x32xbf16, #tpu.memory_space<vmem>>, vector<16x32xbf16>
    tpu.vector_store %arg4[%c0_9, %c0_10], %25 {strides = array<i32>} : memref<16x32xbf16, #tpu.memory_space<vmem>>, vector<16x32xbf16>,
    return
  }
  func.func @transform_0(%arg0: i32) -> (i32, i32) {
    %c0_i32 = arith.constant 0 : i32
    %c0_i32_0 = arith.constant 0 : i32
    return %arg0, %c0_i32 : i32, i32
  }
  func.func @transform_1(%arg0: i32) -> (i32, i32) {
    %c0_i32 = arith.constant 0 : i32
    %c0_i32_0 = arith.constant 0 : i32
    %c0_i32_1 = arith.constant 0 : i32
    return %c0_i32, %c0_i32_0 : i32, i32
  }
  func.func @transform_2(%arg0: i32) -> (i32, i32) {
    %c0_i32 = arith.constant 0 : i32
    %c0_i32_0 = arith.constant 0 : i32
    %c0_i32_1 = arith.constant 0 : i32
    return %c0_i32, %c0_i32_0 : i32, i32
  }
  func.func @transform_3(%arg0: i32) -> (i32, i32) {
    %c0_i32 = arith.constant 0 : i32
    %c0_i32_0 = arith.constant 0 : i32
    return %arg0, %c0_i32 : i32, i32
  }
}

</mosaic_0001>

<bundles_post_ra>
// kernel: tpu_custom_call.1
= control target key start
LH: loop header
LB: loop body
LE: loop exit
PB: predicated region body
PF: predicated region fallthrough
CT: control target
= control target key end

     0   :  { %8 = vsyncpa [#allocation3], 0  ;;  %s229_s0 = inlined_call_operand.hbm [shape: f32[16,32], index: 0, kind: input, shape index: {}]   ;;  %s230_s1 = inlined_call_operand.vmem [shape: f32[1,32], index: 1, kind: input, shape index: {}]   ;;  %s231_s2 = inlined_call_operand.vmem [shape: f32[1,32], index: 2, kind: input, shape index: {}]   ;;  %s232_s3 = inlined_call_operand.hbm [shape: bf16[16,32], index: 3, kind: output, shape index: {}]  }
   0x1   :  { %9 = vsyncpa [#allocation4], 0  ;;  %s169_s12 = smov [#allocation2]   ;;  %s121_s16 = scalar_lea.hbm %s229_s0, 256 }
   0x2   :  { %s15_s13 = sshll.u32 %s169_s12, 4  ;;  %p122_p0 = scmp.ne.s32.totalorder %s229_s0, %s121_s16  ;;  %s16_s13 = int_to_ptr.vmem [resolvable:$true] %s15_s13 }
   0x3   :  { %p125_p1 = scmp.lt.u32.totalorder %s121_s16, %s229_s0 }
   0x5   :  { %p127_p2 = pnand %p125_p1, %p122_p0 }
   0x7   :  { %130 = shalt.err (!%p127_p2)
}
   0x8   :  { %s131_s21 = scalar_lea.vmem %s16_s13, 256  ;;  %p136_p4 = scmp.lt.s32.totalorder %s16_s13, %s16_s13 }
   0x9   :  { %p132_p3 = scmp.ne.s32.totalorder %s16_s13, %s131_s21  ;;  %p137_p5 = scmp.lt.s32.totalorder %s131_s21, %s131_s21 }
   0xb   :  { %p138_p6 = por %p137_p5, %p136_p4 }
   0xd   :  { %p139_p7 = pnand %p138_p6, %p132_p3 }
   0xf   :  { %142 = shalt.err (!%p139_p7)
}
  0x10   :  { %s170_s22 = smov 128   ;;  %s171_s23 = smov 8  }
  0x11   :  { %21 = dma.hbm_to_vmem [thread:$0]  %s229_s0, 256, %s16_s13, [#allocation3], %s170_s22, %s170_s22, %s171_s23  }
  0x12   :  { %165 = dma.done.wait [#allocation3], 256  }
  0x13   :  { %166 = vsyncadd [#allocation3], 4294967040  ;;  %vm31_vm0 = vcmask 261120   ;;  %v29_v0 = vld [vmem:[#allocation2] sm:$0xff]  ;;  %v30_v1 = vld [vmem:[#allocation2 + $0x8] sm:$0xff]  ;;  %vm85_vm1 = vcmask 257024  }
  0x14   :  { %v32_v2 = vsel %vm31_vm0, %v29_v0, 0.0  ;;  %v35_v3 = vsel %vm31_vm0, %v30_v1, 0.0  ;;  %v105_v21 = vld [vmem:[%s230_s1] ss:$0 sm:$0xff]  ;;  %s172_s29 = smov [#allocation5]  }
  0x15   :  { %33 = vadd.xlane.f32.xlu0 %v32_v2  ;;  %v106_v23 = vld [vmem:[%s231_s2] ss:$0 sm:$0xff]  ;;  %s93_s30 = sshll.u32 %s172_s29, 4  ;;  %s94_s30 = int_to_ptr.vmem [resolvable:$true] %s93_s30 }
  0x16   :  { %s143_s1 = scalar_lea.vmem %s94_s30, 128  ;;  %p148_p9 = scmp.lt.s32.totalorder %s94_s30, %s94_s30 }
  0x17   :  { %p144_p8 = scmp.ne.s32.totalorder %s94_s30, %s143_s1  ;;  %p149_p10 = scmp.lt.s32.totalorder %s143_s1, %s143_s1 }
  0x19   :  { %36 = vadd.xlane.f32.xlu0 %v35_v3  ;;  %p150_p11 = por %p149_p10, %p148_p9 }
  0x1b   :  { %p151_p12 = pnand %p150_p11, %p144_p8 }
  0xa2   :  { %v34_v4 = vpop.xlane.xlu0 %33 }
  0xa3   :  { %v39_v5 = vmul.f32 0.03125, %v34_v4 }
  0xa5   :  { %v41_v6 = vsub.f32 %v29_v0, %v39_v5 }
  0xa6   :  { %v37_v7 = vpop.xlane.xlu0 %36 }
  0xa7   :  { %v40_v8 = vmul.f32 0.03125, %v37_v7  ;;  %v43_v9 = vmul.f32 %v41_v6, %v41_v6 }
  0xa9   :  { %v42_v10 = vsub.f32 %v30_v1, %v40_v8  ;;  %v45_v11 = vsel %vm31_vm0, %v43_v9, 0.0 }
  0xaa   :  { %46 = vadd.xlane.f32.xlu1 %v45_v11 }
  0xab   :  { %v44_v12 = vmul.f32 %v42_v10, %v42_v10 }
  0xad   :  { %v48_v13 = vsel %vm31_vm0, %v44_v12, 0.0 }
  0xae   :  { %49 = vadd.xlane.f32.xlu1 %v48_v13 }
 0x137   :  { %v47_v14 = vpop.xlane.xlu1 %46 }
 0x138   :  { %v51_v15 = vmul.f32 0.03125, %v47_v14 }
 0x13a   :  { %v53_v16 = vadd.f32 1e-05, %v51_v15 }
 0x13b   :  { %v50_v17 = vpop.xlane.xlu1 %49 }
 0x13c   :  { %117 = vrsqrt.f32 %v53_v16  ;;  %v52_v18 = vmul.f32 0.03125, %v50_v17 }
 0x13e   :  { %v54_v19 = vadd.f32 1e-05, %v52_v18 }
 0x140   :  { %119 = vrsqrt.f32 %v54_v19 }
 0x146   :  { %v118_v20 = vpop.eup %117 }
 0x147   :  { %v57_v22 = vmul.f32 %v118_v20, %v41_v6 }
 0x149   :  { %v66_v24 = vmul.f32 %v105_v21, %v57_v22 }
 0x14a   :  { %v120_v25 = vpop.eup %119 }
 0x14b   :  { %v58_v26 = vmul.f32 %v120_v25, %v42_v10  ;;  %v75_v27 = vadd.f32 %v106_v23, %v66_v24 }
 0x14d   :  { %v67_v28 = vmul.f32 %v105_v21, %v58_v26  ;;  %v109_v29 = vpack.c.bf16 %v75_v27, %v75_v27 }
 0x14f   :  { %v76_v30 = vadd.f32 %v106_v23, %v67_v28  ;;  %86 = vst.msk [vmem:[#allocation5] sm:$0xf] %vm85_vm1, %v109_v29 }
 0x151   :  { %v110_v31 = vpack.c.bf16 %v76_v30, %v76_v30 }
 0x153   :  { %87 = vst.msk [vmem:[#allocation5 + $0x4] sm:$0xf] %vm85_vm1, %v110_v31 }
 0x154   :  { %154 = shalt.err (!%p151_p12)
}
 0x155   :  { %s155_s5 = scalar_lea.hbm %s232_s3, 128 }
 0x156   :  { %p156_p13 = scmp.ne.s32.totalorder %s232_s3, %s155_s5  ;;  %p159_p0 = scmp.lt.u32.totalorder %s155_s5, %s232_s3 }
 0x158   :  { %p161_p1 = pnand %p159_p0, %p156_p13 }
 0x15a   :  { %164 = shalt.err (!%p161_p1)
}
 0x15b   :  { %s173_s10 = smov 64   ;;  %s174_s11 = smov 4  }
 0x15c   :  { %99 = dma.vmem_to_hbm [thread:$0]  %s94_s30, 128, %s232_s3, [#allocation4], %s173_s10, %s173_s10, %s174_s11  }
 0x15d   :  { %167 = dma.done.wait [#allocation4], 128  }
 0x15e   :  { %168 = vsyncadd [#allocation4], 4294967168 }
 0x15f   :  { %103 = vsyncpa [#allocation3], 1 }
 0x160   :  { %104 = vsyncpa [#allocation4], 1 }

</bundles_post_ra>
